<compile_context>
chip_gen: v5e
topology: v5e:2x2
jax: 0.10.0
libtpu: 0.0.40
codegen_flags: <defaults>
</compile_context>

<pallas_src>
import functools

import jax
import jax.numpy as jnp
from jax.experimental import pallas as pl
from jax.experimental.pallas import tpu as pltpu

FEATURE_DIM = 1024
H1, H2 = 256, 128
OUT_PAD = 128                    # lane-dense padded logit width
OUTPUT_DIM = {"USDL": 101, "MUSDL": 21}
NEG_BIG = -1e30                  # padded logit lanes -> prob exactly 0
TB_CAP = 256                     # batch-tile rows (MXU-shaped, VMEM-safe on v7x)


def _round_up(x, m):
    return ((x + m - 1) // m) * m


def _musdl_fused_kernel(x_ref, w1_ref, b1_ref, w2_ref, b2_ref, w3_ref, b3_ref,
                        o_ref):
    """One batch tile, all judges.

    Layer 1 is one wide MXU matmul over the concatenated judge weights; layers
    2/3 + softmax run per judge via a static Python unroll (J <= 7).  Each
    judge writes its own lane-dense 128-wide slice of the output slab.
    """
    n_judges = w2_ref.shape[0]

    x = x_ref[...].astype(jnp.bfloat16)                          # (TB, F)

    # Fused layer 1 for all judges: (TB, F) @ (F, J*H1), f32 accumulation.
    h1 = jnp.dot(x, w1_ref[...], preferred_element_type=jnp.float32)
    h1 = jnp.maximum(h1 + b1_ref[...], 0.0)                      # (TB, J*H1)

    for j in range(n_judges):                                    # static unroll
        hj = h1[:, j * H1:(j + 1) * H1].astype(jnp.bfloat16)     # (TB, H1)

        h2 = jnp.dot(hj, w2_ref[j], preferred_element_type=jnp.float32)
        h2 = jnp.maximum(h2 + b2_ref[j], 0.0).astype(jnp.bfloat16)   # (TB, H2)

        logits = jnp.dot(h2, w3_ref[j], preferred_element_type=jnp.float32)
        logits = logits + b3_ref[j]                              # (TB, OUT_PAD)

        # Numerically stable softmax; padded lanes sit at ~-1e30 -> exp == 0,
        # so normalization over the real out_dim lanes is exact.  Epilogue
        # stays in f32.  approx=False keeps exact sum-to-1 rows (the divide is
        # negligible for this DMA-bound kernel).
        m = jnp.max(logits, axis=-1, keepdims=True)
        e = jnp.exp(logits - m)
        s = jnp.sum(e, axis=-1, keepdims=True)
        probs = e * pl.reciprocal(s, approx=False)
        o_ref[:, j * OUT_PAD:(j + 1) * OUT_PAD] = probs.astype(o_ref.dtype)


@functools.partial(jax.jit, static_argnames=("out_dim", "model_type"))
def _musdl_forward(feats_avg, w1, b1, w2, b2, w3, b3, *, out_dim, model_type):
    B, F = feats_avg.shape
    J = w2.shape[0]

    # Batch tiling: sublane-aligned, MXU-shaped, capped so double-buffered
    # x/output tiles + resident weights stay inside v7x's 32 MiB scoped VMEM.
    TB = TB_CAP if B >= TB_CAP else _round_up(B, 8)
    B_pad = _round_up(B, TB)
    x = feats_avg if B_pad == B else jnp.pad(feats_avg,
                                             ((0, B_pad - B), (0, 0)))

    # Weight specs return a constant block index -> blocks are not re-fetched
    # across batch-tile steps (weights are VMEM-resident for the whole grid).
    # TODO(synk): single-buffer the constant-index weight specs
    # (pipeline_mode=pl.Buffered(1)) if larger batch tiles ever need the VMEM
    # headroom; at TB=256 even double-buffered weights fit with large margin.
    grid_spec = pltpu.PrefetchScalarGridSpec(
        num_scalar_prefetch=0,
        grid=(B_pad // TB,),
        in_specs=[
            pl.BlockSpec((TB, F), lambda i: (i, 0)),              # features
            pl.BlockSpec((F, J * H1), lambda i: (0, 0)),          # w1 (fused)
            pl.BlockSpec((1, J * H1), lambda i: (0, 0)),          # b1 (fused)
            pl.BlockSpec((J, H1, H2), lambda i: (0, 0, 0)),       # w2
            pl.BlockSpec((J, 1, H2), lambda i: (0, 0, 0)),        # b2
            pl.BlockSpec((J, H2, OUT_PAD), lambda i: (0, 0, 0)),  # w3 (padded)
            pl.BlockSpec((J, 1, OUT_PAD), lambda i: (0, 0, 0)),   # b3 (padded)
        ],
        out_specs=pl.BlockSpec((TB, J * OUT_PAD), lambda i: (i, 0)),
    )

    probs_slab = pl.pallas_call(
        _musdl_fused_kernel,
        out_shape=jax.ShapeDtypeStruct((B_pad, J * OUT_PAD), jnp.float32),
        grid_spec=grid_spec,
        compiler_params=pltpu.CompilerParams(
            dimension_semantics=("parallel",)),
    )(x, w1, b1, w2, b2, w3, b3)

    # Drop padded batch rows, free row-major reshape, slice the padded lanes.
    probs = probs_slab[:B].reshape(B, J, OUT_PAD)[..., :out_dim]
    if model_type == "USDL":
        return probs[:, 0]                           # (B, 101)
    return probs                                     # (B, J, 21)


def _init_linear(key, fan_in, fan_out):
    """Deterministic init mimicking torch.nn.Linear defaults (uniform)."""
    kw, kb = jax.random.split(key)
    bound = 1.0 / jnp.sqrt(float(fan_in))
    # stored already transposed to (fan_in, fan_out) for x @ W
    w = jax.random.uniform(kw, (fan_in, fan_out), jnp.float32, -bound, bound)
    b = jax.random.uniform(kb, (fan_out,), jnp.float32, -bound, bound)
    return w, b


class MUSDL:
    """JAX/Pallas re-implementation of the MUSDL head."""

    def __init__(self, num_judges=1, key=jax.random.PRNGKey(0)):
        self.model_type = "USDL" if num_judges == 1 else "MUSDL"
        self.num_judges = num_judges
        out_dim = OUTPUT_DIM[self.model_type]
        self.out_dim = out_dim

        w1s, b1s, w2s, b2s, w3s, b3s = [], [], [], [], [], []
        keys = jax.random.split(key, num_judges)
        for jk in keys:
            k1, k2, k3 = jax.random.split(jk, 3)
            w1, b1 = _init_linear(k1, FEATURE_DIM, H1)
            w2, b2 = _init_linear(k2, H1, H2)
            w3, b3 = _init_linear(k3, H2, out_dim)
            w1s.append(w1); b1s.append(b1)
            w2s.append(w2); b2s.append(b2)
            # pad layer-3 columns to a lane-dense OUT_PAD; bias pad = -1e30 so
            # the padded lanes get probability 0 under softmax.
            w3s.append(jnp.pad(w3, ((0, 0), (0, OUT_PAD - out_dim))))
            b3s.append(jnp.pad(b3, (0, OUT_PAD - out_dim),
                               constant_values=NEG_BIG))

        # Fused layer-1 weights: (F, J*H1) in bf16; biases stay f32 (tiny).
        # TODO(synk): quantize w1 (the dominant ~3.5 MiB) to int8 (v5e/v6e) or
        # fp8-e4m3 (v7x) with per-column scales to halve weight-DMA bytes.
        self.w1 = jnp.concatenate(w1s, axis=1).astype(jnp.bfloat16)
        self.b1 = jnp.concatenate(b1s, axis=0).reshape(1, num_judges * H1)
        self.w2 = jnp.stack(w2s).astype(jnp.bfloat16)            # (J, H1, H2)
        self.b2 = jnp.stack(b2s).reshape(num_judges, 1, H2)
        self.w3 = jnp.stack(w3s).astype(jnp.bfloat16)            # (J, H2, 128)
        self.b3 = jnp.stack(b3s).reshape(num_judges, 1, OUT_PAD)

    def __call__(self, feats_avg):
        return _musdl_forward(feats_avg, self.w1, self.b1, self.w2, self.b2,
                              self.w3, self.b3, out_dim=self.out_dim,
                              model_type=self.model_type)


def _reference(feats_avg, model):
    """Pure-JAX reference (same bf16 matmul path) for verification."""
    out_dim = model.out_dim
    xb = feats_avg.astype(jnp.bfloat16)
    outs = []
    for j in range(model.num_judges):
        w1 = model.w1[:, j * H1:(j + 1) * H1]
        b1 = model.b1[:, j * H1:(j + 1) * H1]
        h = jnp.maximum(
            jnp.dot(xb, w1, preferred_element_type=jnp.float32) + b1, 0.0)
        h = jnp.maximum(
            jnp.dot(h.astype(jnp.bfloat16), model.w2[j],
                    preferred_element_type=jnp.float32) + model.b2[j], 0.0)
        logits = jnp.dot(h.astype(jnp.bfloat16), model.w3[j, :, :out_dim],
                         preferred_element_type=jnp.float32)
        logits = logits + model.b3[j, :, :out_dim]
        outs.append(jax.nn.softmax(logits, axis=-1))
    if model.model_type == "USDL":
        return outs[0]
    return jnp.stack(outs, axis=1)


if __name__ == "__main__":
    key = jax.random.PRNGKey(0)
    k_feat, k_feat2, k_usdl, k_musdl = jax.random.split(key, 4)

    B = 2
    feats_avg = jax.random.normal(k_feat, (B, FEATURE_DIM), jnp.float32)

    # USDL (num_judges == 1) -> (B, 101)
    usdl = MUSDL(num_judges=1, key=k_usdl)
    probs_usdl = jax.block_until_ready(usdl(feats_avg))
    assert probs_usdl.shape == (B, 101)
    ref_usdl = _reference(feats_avg, usdl)
    assert jnp.allclose(probs_usdl, ref_usdl, atol=2e-3, rtol=1e-3)
    assert jnp.allclose(jnp.sum(probs_usdl, axis=-1), 1.0, atol=1e-5)

    # MUSDL (num_judges == 3) -> (B, 3, 21)
    musdl = MUSDL(num_judges=3, key=k_musdl)
    probs_musdl = jax.block_until_ready(musdl(feats_avg))
    assert probs_musdl.shape == (B, 3, 21)
    ref_musdl = _reference(feats_avg, musdl)
    assert jnp.allclose(probs_musdl, ref_musdl, atol=2e-3, rtol=1e-3)
    assert jnp.allclose(jnp.sum(probs_musdl, axis=-1), 1.0, atol=1e-5)

    # Larger, non-tile-aligned batch -> exercises the batch-tiled grid
    # (TB=256, 2 grid steps) and row padding/slicing.
    B2 = 300
    feats_big = jax.random.normal(k_feat2, (B2, FEATURE_DIM), jnp.float32)
    probs_big = jax.block_until_ready(musdl(feats_big))
    assert probs_big.shape == (B2, 3, 21)
    ref_big = _reference(feats_big, musdl)
    assert jnp.allclose(probs_big, ref_big, atol=2e-3, rtol=1e-3)
    assert jnp.allclose(jnp.sum(probs_big, axis=-1), 1.0, atol=1e-5)

    print("KERNEL_OK")
</pallas_src>

<mosaic_0001>
module attributes {stable_mosaic.version = 11 : i64} {
  func.func @_musdl_fused_kernel(%arg0: i32, %arg1: memref<8x1024xf32, #tpu.memory_space<vmem>>, %arg2: memref<1024x256xbf16, #tpu.memory_space<vmem>>, %arg3: memref<1x256xf32, #tpu.memory_space<vmem>>, %arg4: memref<1x256x128xbf16, #tpu.memory_space<vmem>>, %arg5: memref<1x1x128xf32, #tpu.memory_space<vmem>>, %arg6: memref<1x128x128xbf16, #tpu.memory_space<vmem>>, %arg7: memref<1x1x128xf32, #tpu.memory_space<vmem>>, %arg8: memref<8x128xf32, #tpu.memory_space<vmem>>) attributes {dimension_semantics = [#tpu.dimension_semantics<parallel>], iteration_bounds = array<i64: 1>, scalar_prefetch = 0 : i64, scratch_operands = 0 : i64, tpu.core_type = #tpu.core_type<tc>, window_params = [{transform_indices = @transform_0, window_bounds = array<i64: 8, 1024>}, {pipeline_mode = #tpu.pipeline_mode<synchronous>, transform_indices = @transform_1, window_bounds = array<i64: 1024, 256>}, {pipeline_mode = #tpu.pipeline_mode<synchronous>, transform_indices = @transform_2, window_bounds = array<i64: 1, 256>}, {pipeline_mode = #tpu.pipeline_mode<synchronous>, transform_indices = @transform_3, window_bounds = array<i64: 1, 256, 128>}, {pipeline_mode = #tpu.pipeline_mode<synchronous>, transform_indices = @transform_4, window_bounds = array<i64: 1, 1, 128>}, {pipeline_mode = #tpu.pipeline_mode<synchronous>, transform_indices = @transform_5, window_bounds = array<i64: 1, 128, 128>}, {pipeline_mode = #tpu.pipeline_mode<synchronous>, transform_indices = @transform_6, window_bounds = array<i64: 1, 1, 128>}, {transform_indices = @transform_7, window_bounds = array<i64: 8, 128>}]} {
    %c0 = arith.constant 0 : index
    %c0_0 = arith.constant 0 : index
    %0 = vector.load %arg1[%c0, %c0_0] : memref<8x1024xf32, #tpu.memory_space<vmem>>, vector<8x1024xf32>
    %1 = arith.truncf %0 : vector<8x1024xf32> to vector<8x1024xbf16>
    %c0_1 = arith.constant 0 : index
    %c0_2 = arith.constant 0 : index
    %2 = vector.load %arg2[%c0_1, %c0_2] : memref<1024x256xbf16, #tpu.memory_space<vmem>>, vector<1024x256xbf16>
    %cst = arith.constant dense<0.000000e+00> : vector<8x256xf32>
    %3 = tpu.matmul %1, %2, %cst {dimension_numbers = #tpu.dot_dimension_numbers<[1], [0], [0], [1], [0, 0, 1, 1], [], []>} : vector<8x1024xbf16>, vector<1024x256xbf16>, vector<8x256xf32> -> vector<8x256xf32>
    %c0_3 = arith.constant 0 : index
    %c0_4 = arith.constant 0 : index
    %4 = vector.load %arg3[%c0_3, %c0_4] : memref<1x256xf32, #tpu.memory_space<vmem>>, vector<1x256xf32>
    %5 = vector.broadcast %4 : vector<1x256xf32> to vector<8x256xf32>
    %6 = arith.addf %3, %5 : vector<8x256xf32>
    %cst_5 = arith.constant 0.000000e+00 : f32
    %7 = vector.broadcast %cst_5 : f32 to vector<8x256xf32>
    %8 = arith.maximumf %6, %7 : vector<8x256xf32>
    %9 = arith.truncf %8 : vector<8x256xf32> to vector<8x256xbf16>
    %c0_6 = arith.constant 0 : index
    %c0_7 = arith.constant 0 : index
    %c0_8 = arith.constant 0 : index
    %10 = vector.load %arg4[%c0_6, %c0_7, %c0_8] : memref<1x256x128xbf16, #tpu.memory_space<vmem>>, vector<1x256x128xbf16>
    %11 = vector.shape_cast %10 : vector<1x256x128xbf16> to vector<256x128xbf16>
    %cst_9 = arith.constant dense<0.000000e+00> : vector<8x128xf32>
    %12 = tpu.matmul %9, %11, %cst_9 {dimension_numbers = #tpu.dot_dimension_numbers<[1], [0], [0], [1], [0, 0, 1, 1], [], []>} : vector<8x256xbf16>, vector<256x128xbf16>, vector<8x128xf32> -> vector<8x128xf32>
    %c0_10 = arith.constant 0 : index
    %c0_11 = arith.constant 0 : index
    %c0_12 = arith.constant 0 : index
    %13 = vector.load %arg5[%c0_10, %c0_11, %c0_12] : memref<1x1x128xf32, #tpu.memory_space<vmem>>, vector<1x1x128xf32>
    %14 = vector.shape_cast %13 : vector<1x1x128xf32> to vector<1x128xf32>
    %15 = vector.broadcast %14 : vector<1x128xf32> to vector<8x128xf32>
    %16 = arith.addf %12, %15 : vector<8x128xf32>
    %cst_13 = arith.constant 0.000000e+00 : f32
    %17 = vector.broadcast %cst_13 : f32 to vector<8x128xf32>
    %18 = arith.maximumf %16, %17 : vector<8x128xf32>
    %19 = arith.truncf %18 : vector<8x128xf32> to vector<8x128xbf16>
    %c0_14 = arith.constant 0 : index
    %c0_15 = arith.constant 0 : index
    %c0_16 = arith.constant 0 : index
    %20 = vector.load %arg6[%c0_14, %c0_15, %c0_16] : memref<1x128x128xbf16, #tpu.memory_space<vmem>>, vector<1x128x128xbf16>
    %21 = vector.shape_cast %20 : vector<1x128x128xbf16> to vector<128x128xbf16>
    %cst_17 = arith.constant dense<0.000000e+00> : vector<8x128xf32>
    %22 = tpu.matmul %19, %21, %cst_17 {dimension_numbers = #tpu.dot_dimension_numbers<[1], [0], [0], [1], [0, 0, 1, 1], [], []>} : vector<8x128xbf16>, vector<128x128xbf16>, vector<8x128xf32> -> vector<8x128xf32>
    %c0_18 = arith.constant 0 : index
    %c0_19 = arith.constant 0 : index
    %c0_20 = arith.constant 0 : index
    %23 = vector.load %arg7[%c0_18, %c0_19, %c0_20] : memref<1x1x128xf32, #tpu.memory_space<vmem>>, vector<1x1x128xf32>
    %24 = vector.shape_cast %23 : vector<1x1x128xf32> to vector<1x128xf32>
    %25 = vector.broadcast %24 : vector<1x128xf32> to vector<8x128xf32>
    %26 = arith.addf %22, %25 : vector<8x128xf32>
    %cst_21 = arith.constant dense<0xFF800000> : vector<8xf32>
    %27 = vector.multi_reduction <maximumf>, %26, %cst_21 [1] : vector<8x128xf32> to vector<8xf32>
    %28 = vector.shape_cast %27 : vector<8xf32> to vector<8x1xf32>
    %29 = vector.broadcast %28 : vector<8x1xf32> to vector<8x128xf32>
    %30 = arith.subf %26, %29 : vector<8x128xf32>
    %31 = math.exp %30 : vector<8x128xf32>
    %cst_22 = arith.constant dense<0.000000e+00> : vector<8xf32>
    %32 = vector.multi_reduction <add>, %31, %cst_22 [1] : vector<8x128xf32> to vector<8xf32>
    %33 = vector.shape_cast %32 : vector<8xf32> to vector<8x1xf32>
    %34 = tpu.reciprocal %33 : vector<8x1xf32> -> vector<8x1xf32>
    %35 = vector.broadcast %34 : vector<8x1xf32> to vector<8x128xf32>
    %36 = arith.mulf %31, %35 : vector<8x128xf32>
    %c0_23 = arith.constant 0 : index
    %c0_24 = arith.constant 0 : index
    %37 = vector.load %arg8[%c0_23, %c0_24] : memref<8x128xf32, #tpu.memory_space<vmem>>, vector<8x128xf32>
    tpu.vector_store %arg8[%c0_23, %c0_24], %36 {strides = array<i32>} : memref<8x128xf32, #tpu.memory_space<vmem>>, vector<8x128xf32>,
    return
  }
  func.func @transform_0(%arg0: i32) -> (i32, i32) {
    %c0_i32 = arith.constant 0 : i32
    %c0_i32_0 = arith.constant 0 : i32
    return %arg0, %c0_i32 : i32, i32
  }
  func.func @transform_1(%arg0: i32) -> (i32, i32) {
    %c0_i32 = arith.constant 0 : i32
    %c0_i32_0 = arith.constant 0 : i32
    %c0_i32_1 = arith.constant 0 : i32
    return %c0_i32, %c0_i32_0 : i32, i32
  }
  func.func @transform_2(%arg0: i32) -> (i32, i32) {
    %c0_i32 = arith.constant 0 : i32
    %c0_i32_0 = arith.constant 0 : i32
    %c0_i32_1 = arith.constant 0 : i32
    return %c0_i32, %c0_i32_0 : i32, i32
  }
  func.func @transform_3(%arg0: i32) -> (i32, i32, i32) {
    %c0_i32 = arith.constant 0 : i32
    %c0_i32_0 = arith.constant 0 : i32
    %c0_i32_1 = arith.constant 0 : i32
    %c0_i32_2 = arith.constant 0 : i32
    return %c0_i32, %c0_i32_0, %c0_i32_1 : i32, i32, i32
  }
  func.func @transform_4(%arg0: i32) -> (i32, i32, i32) {
    %c0_i32 = arith.constant 0 : i32
    %c0_i32_0 = arith.constant 0 : i32
    %c0_i32_1 = arith.constant 0 : i32
    %c0_i32_2 = arith.constant 0 : i32
    return %c0_i32, %c0_i32_0, %c0_i32_1 : i32, i32, i32
  }
  func.func @transform_5(%arg0: i32) -> (i32, i32, i32) {
    %c0_i32 = arith.constant 0 : i32
    %c0_i32_0 = arith.constant 0 : i32
    %c0_i32_1 = arith.constant 0 : i32
    %c0_i32_2 = arith.constant 0 : i32
    return %c0_i32, %c0_i32_0, %c0_i32_1 : i32, i32, i32
  }
  func.func @transform_6(%arg0: i32) -> (i32, i32, i32) {
    %c0_i32 = arith.constant 0 : i32
    %c0_i32_0 = arith.constant 0 : i32
    %c0_i32_1 = arith.constant 0 : i32
    %c0_i32_2 = arith.constant 0 : i32
    return %c0_i32, %c0_i32_0, %c0_i32_1 : i32, i32, i32
  }
  func.func @transform_7(%arg0: i32) -> (i32, i32) {
    %c0_i32 = arith.constant 0 : i32
    %c0_i32_0 = arith.constant 0 : i32
    return %arg0, %c0_i32 : i32, i32
  }
}

</mosaic_0001>

<bundles_post_ra>
// kernel: _musdl_forward.1
= control target key start
LH: loop header
LB: loop body
LE: loop exit
PB: predicated region body
PF: predicated region fallthrough
CT: control target
= control target key end

     0   :  { %12 = vsyncpa [#allocation3], 0  ;;  %s2298_s0 = inlined_call_operand.vmem [shape: f32[8,1024], index: 0, kind: input, shape index: {}]   ;;  %s2299_s1 = inlined_call_operand.hbm [shape: bf16[1024,256], index: 1, kind: input, shape index: {}]   ;;  %s2300_s2 = inlined_call_operand.vmem [shape: f32[1,256], index: 2, kind: input, shape index: {}]   ;;  %s2301_s3 = inlined_call_operand.hbm [shape: bf16[1,256,128], index: 3, kind: input, shape index: {}]   ;;  %s2302_s4 = inlined_call_operand.vmem [shape: f32[1,1,128], index: 4, kind: input, shape index: {}]   ;;  %s2303_s5 = inlined_call_operand.vmem [shape: bf16[1,128,128], index: 5, kind: input, shape index: {}]   ;;  %s2304_s6 = inlined_call_operand.vmem [shape: f32[1,1,128], index: 6, kind: input, shape index: {}]   ;;  %s2305_s7 = inlined_call_operand.vmem [shape: f32[8,128], index: 7, kind: output, shape index: {}]  }
   0x1   :  { %s20_s26 = sshll.u32 %s2299_s1, 4  ;;  %s21_s26 = int_to_ptr.hbm [resolvable:$true] %s20_s26 }
   0x2   :  { %13 = vsyncpa [#allocation5], 0  ;;  %s2154_s27 = smov [#allocation2]   ;;  %s35_s8 = sshll.u32 %s2301_s3, 4  ;;  %s36_s8 = int_to_ptr.hbm [resolvable:$true] %s35_s8 }
   0x3   :  { %s22_s28 = sshll.u32 %s2154_s27, 4  ;;  %s2155_s9 = smov 128   ;;  %s23_s28 = int_to_ptr.vmem [resolvable:$true] %s22_s28 }
   0x4   :  { %s2156_s10 = smov 8   ;;  %s2157_s11 = smov [#allocation4]  }
   0x5   :  { %28 = dma.hbm_to_vmem [thread:$0]  %s21_s26, 16384, %s23_s28, [#allocation3], %s2155_s9, %s2155_s9, %s2156_s10  }
   0x6   :  { %s37_s12 = sshll.u32 %s2157_s11, 4  ;;  %s2158_s13 = smov 64   ;;  %s38_s12 = int_to_ptr.vmem [resolvable:$true] %s37_s12 }
   0x7   :  { %s2159_s14 = smov 4  }
   0x8   :  { %43 = dma.hbm_to_vmem [thread:$0]  %s36_s8, 2048, %s38_s12, [#allocation5], %s2158_s13, %s2158_s13, %s2159_s14  }
   0x9   :  { %2150 = dma.done.wait [#allocation3], 16384  }
   0xa   :  { %2151 = vsyncadd [#allocation3], 4294950912 }
   0xb   :  { %2152 = dma.done.wait [#allocation5], 2048  }
   0xc   :  { %2153 = vsyncadd [#allocation5], 4294965248  ;;  %v1388_v0 = vld [vmem:[#allocation2 + $0x70] sm:$0xf]  ;;  %v1953_v1 = vld [vmem:[#allocation2 + $0x74] sm:$0xf0] }
   0xd   :  { %v1452_v2 = vld [vmem:[#allocation2 + $0xf0] sm:$0xf]  ;;  %v1389_v3 = vor.u32 %v1953_v1, %v1388_v0  ;;  %v1969_v4 = vld [vmem:[#allocation2 + $0xf4] sm:$0xf0]  ;;  %v1380_v11 = vld [vmem:[#allocation2 + $0x60] sm:$0xf] }
   0xe   :  { %v1516_v5 = vld [vmem:[#allocation2 + $0x170] sm:$0xf]  ;;  %v1985_v6 = vld [vmem:[#allocation2 + $0x174] sm:$0xf0]  ;;  %v1453_v7 = vor.u32 %v1969_v4, %v1452_v2  ;;  %v1951_v13 = vld [vmem:[#allocation2 + $0x64] sm:$0xf0] }
   0xf   :  { %v1517_v8 = vor.u32 %v1985_v6, %v1516_v5  ;;  %v1580_v9 = vld [vmem:[#allocation2 + $0x1f0] sm:$0xf]  ;;  %v2001_v10 = vld [vmem:[#allocation2 + $0x1f4] sm:$0xf0]  ;;  %848 = vmatpush.bf16.msra.mxu0 %v1389_v3  ;;  %v1444_v14 = vld [vmem:[#allocation2 + $0xe0] sm:$0xf]  ;;  %v1381_v16 = vor.u32 %v1951_v13, %v1380_v11 }
  0x10   :  { %v1581_v12 = vor.u32 %v2001_v10, %v1580_v9  ;;  %v1967_v15 = vld [vmem:[#allocation2 + $0xe4] sm:$0xf0]  ;;  %861 = vmatpush.bf16.msra.mxu1 %v1453_v7  ;;  %v1508_v18 = vld [vmem:[#allocation2 + $0x160] sm:$0xf]  ;;  %v1372_v23 = vld [vmem:[#allocation2 + $0x50] sm:$0xf] }
  0x11   :  { %874 = vmatpush.bf16.msra.mxu2 %v1517_v8  ;;  %v1445_v17 = vor.u32 %v1967_v15, %v1444_v14  ;;  %v1983_v19 = vld [vmem:[#allocation2 + $0x164] sm:$0xf0]  ;;  %v1572_v20 = vld [vmem:[#allocation2 + $0x1e0] sm:$0xf]  ;;  %v1949_v24 = vld [vmem:[#allocation2 + $0x54] sm:$0xf0] }
  0x12   :  { %887 = vmatpush.bf16.msra.mxu3 %v1581_v12  ;;  %v1509_v21 = vor.u32 %v1983_v19, %v1508_v18  ;;  %v1999_v22 = vld [vmem:[#allocation2 + $0x1e4] sm:$0xf0]  ;;  %v1436_v26 = vld [vmem:[#allocation2 + $0xd0] sm:$0xf]  ;;  %v1965_v27 = vld [vmem:[#allocation2 + $0xd4] sm:$0xf0]  ;;  %v1373_v29 = vor.u32 %v1949_v24, %v1372_v23 }
  0x13   :  { %v1573_v25 = vor.u32 %v1999_v22, %v1572_v20  ;;  %v1500_v28 = vld [vmem:[#allocation2 + $0x150] sm:$0xf]  ;;  %849 = vmatpush.bf16.msra.mxu0 %v1381_v16  ;;  %v1981_v30 = vld [vmem:[#allocation2 + $0x154] sm:$0xf0]  ;;  %v1437_v33 = vor.u32 %v1965_v27, %v1436_v26  ;;  %v1364_v35 = vld [vmem:[#allocation2 + $0x40] sm:$0xf] }
  0x14   :  { %v1564_v31 = vld [vmem:[#allocation2 + $0x1d0] sm:$0xf]  ;;  %v1997_v32 = vld [vmem:[#allocation2 + $0x1d4] sm:$0xf0]  ;;  %862 = vmatpush.bf16.msra.mxu1 %v1445_v17  ;;  %v1501_v34 = vor.u32 %v1981_v30, %v1500_v28  ;;  %v1947_v36 = vld [vmem:[#allocation2 + $0x44] sm:$0xf0] }
  0x15   :  { %875 = vmatpush.bf16.msra.mxu2 %v1509_v21  ;;  %v1428_v37 = vld [vmem:[#allocation2 + $0xc0] sm:$0xf]  ;;  %v1565_v38 = vor.u32 %v1997_v32, %v1564_v31  ;;  %v1963_v39 = vld [vmem:[#allocation2 + $0xc4] sm:$0xf0]  ;;  %v1365_v44 = vor.u32 %v1947_v36, %v1364_v35  ;;  %v1356_v47 = vld [vmem:[#allocation2 + $0x30] sm:$0xf] }
  0x16   :  { %888 = vmatpush.bf16.msra.mxu3 %v1573_v25  ;;  %v1492_v40 = vld [vmem:[#allocation2 + $0x140] sm:$0xf]  ;;  %v1979_v41 = vld [vmem:[#allocation2 + $0x144] sm:$0xf0]  ;;  %v1429_v45 = vor.u32 %v1963_v39, %v1428_v37  ;;  %v1945_v48 = vld [vmem:[#allocation2 + $0x34] sm:$0xf0] }
  0x17   :  { %v1556_v42 = vld [vmem:[#allocation2 + $0x1c0] sm:$0xf]  ;;  %v1995_v43 = vld [vmem:[#allocation2 + $0x1c4] sm:$0xf0]  ;;  %850 = vmatpush.bf16.msra.mxu0 %v1373_v29  ;;  %v1493_v46 = vor.u32 %v1979_v41, %v1492_v40  ;;  %v1420_v49 = vld [vmem:[#allocation2 + $0xb0] sm:$0xf]  ;;  %v1357_v56 = vor.u32 %v1945_v48, %v1356_v47 }
  0x18   :  { %863 = vmatpush.bf16.msra.mxu1 %v1437_v33  ;;  %v1557_v50 = vor.u32 %v1995_v43, %v1556_v42  ;;  %v1961_v51 = vld [vmem:[#allocation2 + $0xb4] sm:$0xf0]  ;;  %v1484_v52 = vld [vmem:[#allocation2 + $0x130] sm:$0xf]  ;;  %v1348_v59 = vld [vmem:[#allocation2 + $0x20] sm:$0xf] }
  0x19   :  { %876 = vmatpush.bf16.msra.mxu2 %v1501_v34  ;;  %v1977_v53 = vld [vmem:[#allocation2 + $0x134] sm:$0xf0]  ;;  %v1548_v54 = vld [vmem:[#allocation2 + $0x1b0] sm:$0xf]  ;;  %v1421_v57 = vor.u32 %v1961_v51, %v1420_v49  ;;  %v1943_v60 = vld [vmem:[#allocation2 + $0x24] sm:$0xf0] }
  0x1a   :  { %889 = vmatpush.bf16.msra.mxu3 %v1565_v38  ;;  %v1993_v55 = vld [vmem:[#allocation2 + $0x1b4] sm:$0xf0]  ;;  %v1485_v58 = vor.u32 %v1977_v53, %v1484_v52  ;;  %v1412_v61 = vld [vmem:[#allocation2 + $0xa0] sm:$0xf]  ;;  %v1959_v63 = vld [vmem:[#allocation2 + $0xa4] sm:$0xf0]  ;;  %v1349_v4 = vor.u32 %v1943_v60, %v1348_v59 }
  0x1b   :  { %851 = vmatpush.bf16.msra.mxu0 %v1365_v44  ;;  %v1549_v62 = vor.u32 %v1993_v55, %v1548_v54  ;;  %v1476_v0 = vld [vmem:[#allocation2 + $0x120] sm:$0xf]  ;;  %v1975_v1 = vld [vmem:[#allocation2 + $0x124] sm:$0xf0]  ;;  %v1413_v5 = vor.u32 %v1959_v63, %v1412_v61  ;;  %v1340_v7 = vld [vmem:[#allocation2 + $0x10] sm:$0xf] }
  0x1c   :  { %864 = vmatpush.bf16.msra.mxu1 %v1429_v45  ;;  %v1540_v2 = vld [vmem:[#allocation2 + $0x1a0] sm:$0xf]  ;;  %v1991_v3 = vld [vmem:[#allocation2 + $0x1a4] sm:$0xf0]  ;;  %v1477_v6 = vor.u32 %v1975_v1, %v1476_v0  ;;  %v1941_v8 = vld [vmem:[#allocation2 + $0x14] sm:$0xf0] }
  0x1d   :  { %877 = vmatpush.bf16.msra.mxu2 %v1493_v46  ;;  %v1404_v9 = vld [vmem:[#allocation2 + $0x90] sm:$0xf]  ;;  %v1541_v10 = vor.u32 %v1991_v3, %v1540_v2  ;;  %v1957_v11 = vld [vmem:[#allocation2 + $0x94] sm:$0xf0]  ;;  %v1341_v16 = vor.u32 %v1941_v8, %v1340_v7  ;;  %v1332_v17 = vld [vmem:[#allocation2] sm:$0xf] }
  0x1e   :  { %890 = vmatpush.bf16.msra.mxu3 %v1557_v50  ;;  %v1468_v12 = vld [vmem:[#allocation2 + $0x110] sm:$0xf]  ;;  %v1973_v13 = vld [vmem:[#allocation2 + $0x114] sm:$0xf0]  ;;  %v1939_v18 = vld [vmem:[#allocation2 + $0x4] sm:$0xf0]  ;;  %v1405_v19 = vor.u32 %v1957_v11, %v1404_v9 }
  0x1f   :  { %852 = vmatpush.bf16.msra.mxu0 %v1357_v56  ;;  %v1532_v14 = vld [vmem:[#allocation2 + $0x190] sm:$0xf]  ;;  %v1989_v15 = vld [vmem:[#allocation2 + $0x194] sm:$0xf0]  ;;  %v1469_v20 = vor.u32 %v1973_v13, %v1468_v12  ;;  %v1396_v21 = vld [vmem:[#allocation2 + $0x80] sm:$0xf]  ;;  %v1333_v31 = vor.u32 %v1939_v18, %v1332_v17 }
  0x20   :  { %865 = vmatpush.bf16.msra.mxu1 %v1421_v57  ;;  %v1955_v22 = vld [vmem:[#allocation2 + $0x84] sm:$0xf0]  ;;  %v1460_v23 = vld [vmem:[#allocation2 + $0x100] sm:$0xf]  ;;  %v1533_v24 = vor.u32 %v1989_v15, %v1532_v14  ;;  %v1644_v28 = vld [vmem:[#allocation2 + $0x270] sm:$0xf] }
  0x21   :  { %878 = vmatpush.bf16.msra.mxu2 %v1485_v58  ;;  %v1971_v25 = vld [vmem:[#allocation2 + $0x104] sm:$0xf0]  ;;  %v1524_v26 = vld [vmem:[#allocation2 + $0x180] sm:$0xf]  ;;  %v2017_v29 = vld [vmem:[#allocation2 + $0x274] sm:$0xf0]  ;;  %v1397_v35 = vor.u32 %v1955_v22, %v1396_v21 }
  0x22   :  { %891 = vmatpush.bf16.msra.mxu3 %v1549_v62  ;;  %v1987_v27 = vld [vmem:[#allocation2 + $0x184] sm:$0xf0]  ;;  %v1708_v30 = vld [vmem:[#allocation2 + $0x2f0] sm:$0xf]  ;;  %v2033_v32 = vld [vmem:[#allocation2 + $0x2f4] sm:$0xf0]  ;;  %v1461_v36 = vor.u32 %v1971_v25, %v1460_v23  ;;  %v1645_v40 = vor.u32 %v2017_v29, %v1644_v28 }
  0x23   :  { %853 = vmatpush.bf16.msra.mxu0 %v1349_v4  ;;  %v1772_v33 = vld [vmem:[#allocation2 + $0x370] sm:$0xf]  ;;  %v2049_v34 = vld [vmem:[#allocation2 + $0x374] sm:$0xf0]  ;;  %v1525_v39 = vor.u32 %v1987_v27, %v1524_v26  ;;  %v1709_v41 = vor.u32 %v2033_v32, %v1708_v30  ;;  %v1636_v43 = vld [vmem:[#allocation2 + $0x260] sm:$0xf] }
  0x24   :  { %866 = vmatpush.bf16.msra.mxu1 %v1413_v5  ;;  %v1836_v37 = vld [vmem:[#allocation2 + $0x3f0] sm:$0xf]  ;;  %v2065_v38 = vld [vmem:[#allocation2 + $0x3f4] sm:$0xf0]  ;;  %v1773_v42 = vor.u32 %v2049_v34, %v1772_v33  ;;  %v2015_v44 = vld [vmem:[#allocation2 + $0x264] sm:$0xf0] }
  0x25   :  { %879 = vmatpush.bf16.msra.mxu2 %v1477_v6  ;;  %v1700_v45 = vld [vmem:[#allocation2 + $0x2e0] sm:$0xf]  ;;  %v1837_v46 = vor.u32 %v2065_v38, %v1836_v37  ;;  %v2031_v47 = vld [vmem:[#allocation2 + $0x2e4] sm:$0xf0]  ;;  %v60_v52 = vld [vmem:[%s2298_s0 + $0x10] sm:$0xff]  ;;  %v1637_v53 = vor.u32 %v2015_v44, %v1636_v43 }
  0x26   :  { %892 = vmatpush.bf16.msra.mxu3 %v1541_v10  ;;  %v1764_v48 = vld [vmem:[#allocation2 + $0x360] sm:$0xf]  ;;  %v2047_v49 = vld [vmem:[#allocation2 + $0x364] sm:$0xf0]  ;;  %v1628_v54 = vld [vmem:[#allocation2 + $0x250] sm:$0xf]  ;;  %v2209_v57 = vpack.c.bf16 %v60_v52, %v60_v52  ;;  %v1701_v58 = vor.u32 %v2031_v47, %v1700_v45 }
  0x27   :  { %854 = vmatpush.bf16.msra.mxu0 %v1341_v16  ;;  %v1828_v50 = vld [vmem:[#allocation2 + $0x3e0] sm:$0xf]  ;;  %v2063_v51 = vld [vmem:[#allocation2 + $0x3e4] sm:$0xf0]  ;;  %v2013_v55 = vld [vmem:[#allocation2 + $0x254] sm:$0xf0]  ;;  %v1765_v59 = vor.u32 %v2047_v49, %v1764_v48 }
  0x28   :  { %867 = vmatpush.bf16.msra.mxu1 %v1405_v19  ;;  %v1692_v56 = vld [vmem:[#allocation2 + $0x2d0] sm:$0xf]  ;;  %v2029_v60 = vld [vmem:[#allocation2 + $0x2d4] sm:$0xf0]  ;;  %v1829_v63 = vor.u32 %v2063_v51, %v1828_v50  ;;  %v58_v0 = vld [vmem:[%s2298_s0] sm:$0xff]  ;;  %v1629_v8 = vor.u32 %v2013_v55, %v1628_v54 }
  0x29   :  { %880 = vmatpush.bf16.msra.mxu2 %v1469_v20  ;;  %v1756_v61 = vld [vmem:[#allocation2 + $0x350] sm:$0xf]  ;;  %v2045_v62 = vld [vmem:[#allocation2 + $0x354] sm:$0xf0]  ;;  %v59_v2 = vld [vmem:[%s2298_s0 + $0x8] sm:$0xff]  ;;  %v2221_v5 = vpack.c.bf16 %v58_v0, %v58_v0  ;;  %v1693_v9 = vor.u32 %v2029_v60, %v1692_v56 }
  0x2a   :  { %893 = vmatpush.bf16.msra.mxu3 %v1533_v24  ;;  %v61_v1 = vld [vmem:[%s2298_s0 + $0x18] sm:$0xff]  ;;  %v1820_v3 = vld [vmem:[#allocation2 + $0x3d0] sm:$0xf]  ;;  %v2225_v7 = vpack.c.bf16 %v59_v2, %v59_v2  ;;  %v1757_v10 = vor.u32 %v2045_v62, %v1756_v61  ;;  %v1620_v11 = vld [vmem:[#allocation2 + $0x240] sm:$0xf] }
  0x2b   :  { %855 = vmatpush.bf16.msra.mxu0 %v1333_v31  ;;  %v2061_v4 = vld [vmem:[#allocation2 + $0x3d4] sm:$0xf0]  ;;  %v2223_v6 = vpack.c.bf16 %v61_v1, %v61_v1  ;;  %v2011_v12 = vld [vmem:[#allocation2 + $0x244] sm:$0xf0]  ;;  %v1684_v13 = vld [vmem:[#allocation2 + $0x2c0] sm:$0xf] }
  0x2c   :  { %868 = vmatpush.bf16.msra.mxu1 %v1397_v35  ;;  %v1821_v14 = vor.u32 %v2061_v4, %v1820_v3  ;;  %v2027_v15 = vld [vmem:[#allocation2 + $0x2c4] sm:$0xf0]  ;;  %v1748_v16 = vld [vmem:[#allocation2 + $0x340] sm:$0xf]  ;;  %v1621_v20 = vor.u32 %v2011_v12, %v1620_v11  ;;  %v1612_v23 = vld [vmem:[#allocation2 + $0x230] sm:$0xf] }
  0x2d   :  { %881 = vmatpush.bf16.msra.mxu2 %v1461_v36  ;;  %v2043_v17 = vld [vmem:[#allocation2 + $0x344] sm:$0xf0]  ;;  %v1812_v18 = vld [vmem:[#allocation2 + $0x3c0] sm:$0xf]  ;;  %v1685_v21 = vor.u32 %v2027_v15, %v1684_v13  ;;  %v2009_v24 = vld [vmem:[#allocation2 + $0x234] sm:$0xf0] }
  0x2e   :  { %894 = vmatpush.bf16.msra.mxu3 %v1525_v39  ;;  %856 = vmatmul.bf16.vlgmr.msra.gmra.mxu0 %v2221_v5  ;;  %v2059_v19 = vld [vmem:[#allocation2 + $0x3c4] sm:$0xf0]  ;;  %v1749_v22 = vor.u32 %v2043_v17, %v1748_v16  ;;  %v1676_v25 = vld [vmem:[#allocation2 + $0x2b0] sm:$0xf]  ;;  %v2025_v27 = vld [vmem:[#allocation2 + $0x2b4] sm:$0xf0]  ;;  %v1613_v32 = vor.u32 %v2009_v24, %v1612_v23 }
  0x2f   :  { %900 = vmatpush.bf16.msrb.mxu0 %v1645_v40  ;;  %869 = vmatmul.bf16.vlgmr.msra.gmra.mxu1 %v2225_v7  ;;  %v1813_v26 = vor.u32 %v2059_v19, %v1812_v18  ;;  %v1740_v28 = vld [vmem:[#allocation2 + $0x330] sm:$0xf]  ;;  %v2041_v29 = vld [vmem:[#allocation2 + $0x334] sm:$0xf0]  ;;  %v1677_v33 = vor.u32 %v2025_v27, %v1676_v25  ;;  %v1604_v35 = vld [vmem:[#allocation2 + $0x220] sm:$0xf] }
  0x30   :  { %913 = vmatpush.bf16.msrb.mxu1 %v1709_v41  ;;  %882 = vmatmul.bf16.vlgmr.msra.gmra.mxu2 %v2209_v57  ;;  %v1804_v30 = vld [vmem:[#allocation2 + $0x3b0] sm:$0xf]  ;;  %v2057_v31 = vld [vmem:[#allocation2 + $0x3b4] sm:$0xf0]  ;;  %v1741_v34 = vor.u32 %v2041_v29, %v1740_v28  ;;  %v2007_v36 = vld [vmem:[#allocation2 + $0x224] sm:$0xf0] }
  0x31   :  { %926 = vmatpush.bf16.msrb.mxu2 %v1773_v42  ;;  %895 = vmatmul.bf16.vlgmr.msra.gmra.mxu3 %v2223_v6  ;;  %v1668_v37 = vld [vmem:[#allocation2 + $0x2a0] sm:$0xf]  ;;  %v1805_v38 = vor.u32 %v2057_v31, %v1804_v30  ;;  %v2023_v39 = vld [vmem:[#allocation2 + $0x2a4] sm:$0xf0]  ;;  %v1605_v44 = vor.u32 %v2007_v36, %v1604_v35  ;;  %v1596_v47 = vld [vmem:[#allocation2 + $0x210] sm:$0xf] }
  0x32   :  { %939 = vmatpush.bf16.msrb.mxu3 %v1837_v46  ;;  %v1732_v40 = vld [vmem:[#allocation2 + $0x320] sm:$0xf]  ;;  %v2039_v41 = vld [vmem:[#allocation2 + $0x324] sm:$0xf0]  ;;  %v1669_v45 = vor.u32 %v2023_v39, %v1668_v37  ;;  %v2005_v48 = vld [vmem:[#allocation2 + $0x214] sm:$0xf0] }
  0x33   :  { %901 = vmatpush.bf16.msrb.mxu0 %v1637_v53  ;;  %v1796_v42 = vld [vmem:[#allocation2 + $0x3a0] sm:$0xf]  ;;  %v2055_v43 = vld [vmem:[#allocation2 + $0x3a4] sm:$0xf0]  ;;  %v1733_v46 = vor.u32 %v2039_v41, %v1732_v40  ;;  %v1660_v49 = vld [vmem:[#allocation2 + $0x290] sm:$0xf]  ;;  %v1597_v56 = vor.u32 %v2005_v48, %v1596_v47 }
  0x34   :  { %914 = vmatpush.bf16.msrb.mxu1 %v1701_v58  ;;  %v1797_v50 = vor.u32 %v2055_v43, %v1796_v42  ;;  %v2021_v51 = vld [vmem:[#allocation2 + $0x294] sm:$0xf0]  ;;  %v1724_v52 = vld [vmem:[#allocation2 + $0x310] sm:$0xf]  ;;  %v1588_v58 = vld [vmem:[#allocation2 + $0x200] sm:$0xf] }
  0x35   :  { %927 = vmatpush.bf16.msrb.mxu2 %v1765_v59  ;;  %v2037_v53 = vld [vmem:[#allocation2 + $0x314] sm:$0xf0]  ;;  %v1788_v54 = vld [vmem:[#allocation2 + $0x390] sm:$0xf]  ;;  %v2003_v59 = vld [vmem:[#allocation2 + $0x204] sm:$0xf0]  ;;  %v1661_v60 = vor.u32 %v2021_v51, %v1660_v49 }
  0x36   :  { %940 = vmatpush.bf16.msrb.mxu3 %v1829_v63  ;;  %v2053_v55 = vld [vmem:[#allocation2 + $0x394] sm:$0xf0]  ;;  %v1725_v61 = vor.u32 %v2037_v53, %v1724_v52  ;;  %v1652_v62 = vld [vmem:[#allocation2 + $0x280] sm:$0xf]  ;;  %v2019_v63 = vld [vmem:[#allocation2 + $0x284] sm:$0xf0]  ;;  %v1589_v11 = vor.u32 %v2003_v59, %v1588_v58 }
  0x37   :  { %902 = vmatpush.bf16.msrb.mxu0 %v1629_v8  ;;  %v1716_v0 = vld [vmem:[#allocation2 + $0x300] sm:$0xf]  ;;  %v1789_v1 = vor.u32 %v2053_v55, %v1788_v54  ;;  %v2035_v2 = vld [vmem:[#allocation2 + $0x304] sm:$0xf0]  ;;  %v1952_v8 = vld [vmem:[#allocation2 + $0x74] sm:$0xf]  ;;  %v1653_v15 = vor.u32 %v2019_v63, %v1652_v62 }
  0x38   :  { %915 = vmatpush.bf16.msrb.mxu1 %v1693_v9  ;;  %v1780_v3 = vld [vmem:[#allocation2 + $0x380] sm:$0xf]  ;;  %v2051_v4 = vld [vmem:[#allocation2 + $0x384] sm:$0xf0]  ;;  %v1390_v9 = vld [vmem:[#allocation2 + $0x78] sm:$0xf0]  ;;  %v1717_v16 = vor.u32 %v2035_v2, %v1716_v0 }
  0x39   :  { %928 = vmatpush.bf16.msrb.mxu2 %v1757_v10  ;;  %v1968_v10 = vld [vmem:[#allocation2 + $0xf4] sm:$0xf]  ;;  %v1454_v12 = vld [vmem:[#allocation2 + $0xf8] sm:$0xf0]  ;;  %v1950_v24 = vld [vmem:[#allocation2 + $0x64] sm:$0xf] }
  0x3a   :  { %941 = vmatpush.bf16.msrb.mxu3 %v1821_v14  ;;  %v1984_v13 = vld [vmem:[#allocation2 + $0x174] sm:$0xf]  ;;  %v1518_v14 = vld [vmem:[#allocation2 + $0x178] sm:$0xf0]  ;;  %v1457_v25 = vor.u32 %v1968_v10, %v1454_v12  ;;  %v1382_v27 = vld [vmem:[#allocation2 + $0x68] sm:$0xf0] }
  0x3b   :  { %903 = vmatpush.bf16.msrb.mxu0 %v1621_v20  ;;  %v2000_v17 = vld [vmem:[#allocation2 + $0x1f4] sm:$0xf]  ;;  %v1582_v18 = vld [vmem:[#allocation2 + $0x1f8] sm:$0xf0]  ;;  %v1781_v20 = vor.u32 %v2051_v4, %v1780_v3  ;;  %v1966_v28 = vld [vmem:[#allocation2 + $0xe4] sm:$0xf]  ;;  %v1385_v39 = vor.u32 %v1950_v24, %v1382_v27 }
  0x3c   :  { %916 = vmatpush.bf16.msrb.mxu1 %v1685_v21  ;;  %v64_v19 = vld [vmem:[%s2298_s0 + $0x30] sm:$0xff]  ;;  %v1393_v21 = vor.u32 %v1952_v8, %v1390_v9  ;;  %v65_v23 = vld [vmem:[%s2298_s0 + $0x38] sm:$0xff]  ;;  %v63_v29 = vld [vmem:[%s2298_s0 + $0x28] sm:$0xff]  ;;  %v1585_v30 = vor.u32 %v2000_v17, %v1582_v18 }
  0x3d   :  { %929 = vmatpush.bf16.msrb.mxu2 %v1749_v22  ;;  %v62_v22 = vld [vmem:[%s2298_s0 + $0x20] sm:$0xff]  ;;  %v2242_v31 = vpack.c.bf16 %v64_v19, %v64_v19  ;;  %v2246_v36 = vpack.c.bf16 %v65_v23, %v65_v23  ;;  %v2248_v40 = vpack.c.bf16 %v63_v29, %v63_v29  ;;  %v1948_v43 = vld [vmem:[#allocation2 + $0x54] sm:$0xf]  ;;  %v1438_v47 = vld [vmem:[#allocation2 + $0xd8] sm:$0xf0] }
  0x3e   :  { %942 = vmatpush.bf16.msrb.mxu3 %v1813_v26  ;;  %v1521_v26 = vor.u32 %v1984_v13, %v1518_v14  ;;  %v2244_v35 = vpack.c.bf16 %v62_v22, %v62_v22  ;;  %v1998_v37 = vld [vmem:[#allocation2 + $0x1e4] sm:$0xf]  ;;  %v1980_v48 = vld [vmem:[#allocation2 + $0x154] sm:$0xf]  ;;  %v1502_v49 = vld [vmem:[#allocation2 + $0x158] sm:$0xf0] }
  0x3f   :  { %904 = vmatpush.bf16.msrb.mxu0 %v1613_v32  ;;  %v1446_v32 = vld [vmem:[#allocation2 + $0xe8] sm:$0xf0]  ;;  %v1566_v51 = vld [vmem:[#allocation2 + $0x1d8] sm:$0xf0]  ;;  %v1505_v54 = vor.u32 %v1980_v48, %v1502_v49  ;;  %v1946_v55 = vld [vmem:[#allocation2 + $0x44] sm:$0xf] }
  0x40   :  { %917 = vmatpush.bf16.msrb.mxu1 %v1677_v33  ;;  %v1982_v33 = vld [vmem:[#allocation2 + $0x164] sm:$0xf]  ;;  %v1449_v41 = vor.u32 %v1966_v28, %v1446_v32  ;;  %v1494_v62 = vld [vmem:[#allocation2 + $0x148] sm:$0xf0]  ;;  %v1944_v4 = vld [vmem:[#allocation2 + $0x34] sm:$0xf] }
  0x41   :  { %930 = vmatpush.bf16.msrb.mxu2 %v1741_v34  ;;  %v1510_v34 = vld [vmem:[#allocation2 + $0x168] sm:$0xf0]  ;;  %v1962_v58 = vld [vmem:[#allocation2 + $0xc4] sm:$0xf]  ;;  %v1358_v8 = vld [vmem:[#allocation2 + $0x38] sm:$0xf0] }
  0x42   :  { %943 = vmatpush.bf16.msrb.mxu3 %v1805_v38  ;;  %v1574_v38 = vld [vmem:[#allocation2 + $0x1e8] sm:$0xf0]  ;;  %v1513_v42 = vor.u32 %v1982_v33, %v1510_v34  ;;  %v1994_v63 = vld [vmem:[#allocation2 + $0x1c4] sm:$0xf]  ;;  %v1960_v9 = vld [vmem:[#allocation2 + $0xb4] sm:$0xf] }
  0x43   :  { %905 = vmatpush.bf16.msrb.mxu0 %v1605_v44  ;;  %v1374_v44 = vld [vmem:[#allocation2 + $0x58] sm:$0xf0]  ;;  %v1558_v0 = vld [vmem:[#allocation2 + $0x1c8] sm:$0xf0]  ;;  %v1976_v12 = vld [vmem:[#allocation2 + $0x134] sm:$0xf] }
  0x44   :  { %918 = vmatpush.bf16.msrb.mxu1 %v1669_v45  ;;  %v1964_v45 = vld [vmem:[#allocation2 + $0xd4] sm:$0xf]  ;;  %v1377_v52 = vor.u32 %v1948_v43, %v1374_v44  ;;  %v1561_v10 = vor.u32 %v1994_v63, %v1558_v0  ;;  %v1486_v13 = vld [vmem:[#allocation2 + $0x138] sm:$0xf0]  ;;  %v1942_v19 = vld [vmem:[#allocation2 + $0x24] sm:$0xf] }
  0x45   :  { %931 = vmatpush.bf16.msrb.mxu2 %v1733_v46  ;;  %v1577_v46 = vor.u32 %v1998_v37, %v1574_v38  ;;  %v1441_v53 = vor.u32 %v1964_v45, %v1438_v47  ;;  %v1992_v14 = vld [vmem:[#allocation2 + $0x1b4] sm:$0xf]  ;;  %v1489_v18 = vor.u32 %v1976_v12, %v1486_v13  ;;  %v1414_v23 = vld [vmem:[#allocation2 + $0xa8] sm:$0xf0]  ;;  %v1974_v24 = vld [vmem:[#allocation2 + $0x124] sm:$0xf] }
  0x46   :  { %944 = vmatpush.bf16.msrb.mxu3 %v1797_v50  ;;  %v1996_v50 = vld [vmem:[#allocation2 + $0x1d4] sm:$0xf]  ;;  %v1542_v27 = vld [vmem:[#allocation2 + $0x1a8] sm:$0xf0]  ;;  %v1342_v33 = vld [vmem:[#allocation2 + $0x18] sm:$0xf0] }
  0x47   :  { %906 = vmatpush.bf16.msrb.mxu0 %v1597_v56  ;;  %v1366_v56 = vld [vmem:[#allocation2 + $0x48] sm:$0xf0]  ;;  %v1569_v59 = vor.u32 %v1996_v50, %v1566_v51  ;;  %v1940_v32 = vld [vmem:[#allocation2 + $0x14] sm:$0xf]  ;;  %v1406_v38 = vld [vmem:[#allocation2 + $0x98] sm:$0xf0] }
  0x48   :  { %919 = vmatpush.bf16.msrb.mxu1 %v1661_v60  ;;  %v1430_v60 = vld [vmem:[#allocation2 + $0xc8] sm:$0xf0]  ;;  %v1956_v34 = vld [vmem:[#allocation2 + $0x94] sm:$0xf]  ;;  %v1534_v43 = vld [vmem:[#allocation2 + $0x198] sm:$0xf0]  ;;  %v1345_v44 = vor.u32 %v1940_v32, %v1342_v33 }
  0x49   :  { %932 = vmatpush.bf16.msrb.mxu2 %v1725_v61  ;;  %v1978_v61 = vld [vmem:[#allocation2 + $0x144] sm:$0xf]  ;;  %v1433_v2 = vor.u32 %v1962_v58, %v1430_v60  ;;  %v1409_v47 = vor.u32 %v1956_v34, %v1406_v38  ;;  %v1398_v50 = vld [vmem:[#allocation2 + $0x88] sm:$0xf0]  ;;  %v1646_v58 = vld [vmem:[#allocation2 + $0x278] sm:$0xf0] }
  0x4a   :  { %945 = vmatpush.bf16.msrb.mxu3 %v1789_v1  ;;  %v1369_v1 = vor.u32 %v1946_v55, %v1366_v56  ;;  %v1497_v3 = vor.u32 %v1978_v61, %v1494_v62  ;;  %v1938_v45 = vld [vmem:[#allocation2 + $0x4] sm:$0xf]  ;;  %v1526_v55 = vld [vmem:[#allocation2 + $0x188] sm:$0xf0]  ;;  %v2016_v56 = vld [vmem:[#allocation2 + $0x274] sm:$0xf] }
  0x4b   :  { %907 = vmatpush.bf16.msrb.mxu0 %v1589_v11  ;;  %v1422_v11 = vld [vmem:[#allocation2 + $0xb8] sm:$0xf0]  ;;  %v1954_v49 = vld [vmem:[#allocation2 + $0x84] sm:$0xf]  ;;  %v2048_v62 = vld [vmem:[#allocation2 + $0x374] sm:$0xf] }
  0x4c   :  { %920 = vmatpush.bf16.msrb.mxu1 %v1653_v15  ;;  %v1550_v15 = vld [vmem:[#allocation2 + $0x1b8] sm:$0xf0]  ;;  %v1425_v17 = vor.u32 %v1960_v9, %v1422_v11  ;;  %v1970_v51 = vld [vmem:[#allocation2 + $0x104] sm:$0xf]  ;;  %v1401_v0 = vor.u32 %v1954_v49, %v1398_v50  ;;  %v1638_v12 = vld [vmem:[#allocation2 + $0x268] sm:$0xf0] }
  0x4d   :  { %933 = vmatpush.bf16.msrb.mxu2 %v1717_v16  ;;  %v1361_v16 = vor.u32 %v1944_v4, %v1358_v8  ;;  %v1553_v22 = vor.u32 %v1992_v14, %v1550_v15  ;;  %v1710_v61 = vld [vmem:[#allocation2 + $0x2f8] sm:$0xf0]  ;;  %v1649_v8 = vor.u32 %v2016_v56, %v1646_v58  ;;  %v2014_v11 = vld [vmem:[#allocation2 + $0x264] sm:$0xf]  ;;  %v1702_v15 = vld [vmem:[#allocation2 + $0x2e8] sm:$0xf0] }
  0x4e   :  { %946 = vmatpush.bf16.msrb.mxu3 %v1781_v20  ;;  %908 = vmatmul.bf16.vlgmr.msrb.gmra.mxu0 %v2244_v35  ;;  %v1350_v20 = vld [vmem:[#allocation2 + $0x28] sm:$0xf0]  ;;  %v1774_v63 = vld [vmem:[#allocation2 + $0x378] sm:$0xf0]  ;;  %v2030_v13 = vld [vmem:[#allocation2 + $0x2e4] sm:$0xf] }
  0x4f   :  { %952 = vmatpush.bf16.msra.mxu0 %v1393_v21  ;;  %921 = vmatmul.bf16.vlgmr.msrb.gmra.mxu1 %v2248_v40  ;;  %v1958_v21 = vld [vmem:[#allocation2 + $0xa4] sm:$0xf]  ;;  %v1353_v28 = vor.u32 %v1942_v19, %v1350_v20  ;;  %v1830_v19 = vld [vmem:[#allocation2 + $0x3e8] sm:$0xf0]  ;;  %v1641_v20 = vor.u32 %v2014_v11, %v1638_v12  ;;  %v1822_v32 = vld [vmem:[#allocation2 + $0x3d8] sm:$0xf0] }
  0x50   :  { %965 = vmatpush.bf16.msra.mxu1 %v1457_v25  ;;  %934 = vmatmul.bf16.vlgmr.msrb.gmra.mxu2 %v2242_v31  ;;  %v1478_v25 = vld [vmem:[#allocation2 + $0x128] sm:$0xf0]  ;;  %v1417_v29 = vor.u32 %v1958_v21, %v1414_v23  ;;  %v1705_v21 = vor.u32 %v2030_v13, %v1702_v15  ;;  %v2012_v23 = vld [vmem:[#allocation2 + $0x254] sm:$0xf]  ;;  %v2010_v38 = vld [vmem:[#allocation2 + $0x244] sm:$0xf] }
  0x51   :  { %978 = vmatpush.bf16.msra.mxu2 %v1521_v26  ;;  %947 = vmatmul.bf16.vlgmr.msrb.gmra.mxu3 %v2246_v36  ;;  %v1990_v26 = vld [vmem:[#allocation2 + $0x1a4] sm:$0xf]  ;;  %v2024_v49 = vld [vmem:[#allocation2 + $0x2b4] sm:$0xf]  ;;  %v1598_v12 = vld [vmem:[#allocation2 + $0x218] sm:$0xf0] }
  0x52   :  { %991 = vmatpush.bf16.msra.mxu3 %v1585_v30  ;;  %v1481_v30 = vor.u32 %v1974_v24, %v1478_v25  ;;  %v1545_v37 = vor.u32 %v1990_v26, %v1542_v27  ;;  %v1630_v24 = vld [vmem:[#allocation2 + $0x258] sm:$0xf0]  ;;  %v2028_v25 = vld [vmem:[#allocation2 + $0x2d4] sm:$0xf] }
  0x53   :  { %953 = vmatpush.bf16.msra.mxu0 %v1385_v39  ;;  %v1972_v39 = vld [vmem:[#allocation2 + $0x114] sm:$0xf]  ;;  %v1694_v27 = vld [vmem:[#allocation2 + $0x2d8] sm:$0xf0]  ;;  %v1633_v33 = vor.u32 %v2012_v23, %v1630_v24  ;;  %v2002_v23 = vld [vmem:[#allocation2 + $0x204] sm:$0xf] }
  0x54   :  { %966 = vmatpush.bf16.msra.mxu1 %v1449_v41  ;;  %v1470_v41 = vld [vmem:[#allocation2 + $0x118] sm:$0xf0]  ;;  %v1697_v34 = vor.u32 %v2028_v25, %v1694_v27  ;;  %v2004_v11 = vld [vmem:[#allocation2 + $0x214] sm:$0xf]  ;;  %v1590_v24 = vld [vmem:[#allocation2 + $0x208] sm:$0xf0] }
  0x55   :  { %979 = vmatpush.bf16.msra.mxu2 %v1513_v42  ;;  %v1988_v42 = vld [vmem:[#allocation2 + $0x194] sm:$0xf]  ;;  %v1473_v48 = vor.u32 %v1972_v39, %v1470_v41  ;;  %v1622_v39 = vld [vmem:[#allocation2 + $0x248] sm:$0xf0]  ;;  %v1662_v15 = vld [vmem:[#allocation2 + $0x298] sm:$0xf0] }
  0x56   :  { %992 = vmatpush.bf16.msra.mxu3 %v1577_v46  ;;  %v1334_v46 = vld [vmem:[#allocation2 + $0x8] sm:$0xf0]  ;;  %v2020_v13 = vld [vmem:[#allocation2 + $0x294] sm:$0xf]  ;;  %v2018_v25 = vld [vmem:[#allocation2 + $0x284] sm:$0xf] }
  0x57   :  { %954 = vmatpush.bf16.msra.mxu0 %v1377_v52  ;;  %v1537_v52 = vor.u32 %v1988_v42, %v1534_v43  ;;  %v1337_v60 = vor.u32 %v1938_v45, %v1334_v46  ;;  %v1686_v42 = vld [vmem:[#allocation2 + $0x2c8] sm:$0xf0]  ;;  %v2042_v43 = vld [vmem:[#allocation2 + $0x344] sm:$0xf] }
  0x58   :  { %967 = vmatpush.bf16.msra.mxu1 %v1441_v53  ;;  %v1462_v53 = vld [vmem:[#allocation2 + $0x108] sm:$0xf0]  ;;  %v2058_v45 = vld [vmem:[#allocation2 + $0x3c4] sm:$0xf] }
  0x59   :  { %980 = vmatpush.bf16.msra.mxu2 %v1505_v54  ;;  %v1986_v54 = vld [vmem:[#allocation2 + $0x184] sm:$0xf]  ;;  %v1654_v27 = vld [vmem:[#allocation2 + $0x288] sm:$0xf0] }
  0x5a   :  { %993 = vmatpush.bf16.msra.mxu3 %v1569_v59  ;;  %v2032_v59 = vld [vmem:[#allocation2 + $0x2f4] sm:$0xf]  ;;  %v1529_v4 = vor.u32 %v1986_v54, %v1526_v55  ;;  %v1806_v55 = vld [vmem:[#allocation2 + $0x3b8] sm:$0xf0] }
  0x5b   :  { %955 = vmatpush.bf16.msra.mxu0 %v1369_v1  ;;  %v1465_v1 = vor.u32 %v1970_v51, %v1462_v53  ;;  %v1713_v9 = vor.u32 %v2032_v59, %v1710_v61  ;;  %v1678_v51 = vld [vmem:[#allocation2 + $0x2b8] sm:$0xf0]  ;;  %v2056_v54 = vld [vmem:[#allocation2 + $0x3b4] sm:$0xf]  ;;  %v1606_v61 = vld [vmem:[#allocation2 + $0x228] sm:$0xf0] }
  0x5c   :  { %968 = vmatpush.bf16.msra.mxu1 %v1433_v2  ;;  %v2064_v2 = vld [vmem:[#allocation2 + $0x3f4] sm:$0xf]  ;;  %v1742_v53 = vld [vmem:[#allocation2 + $0x338] sm:$0xf0]  ;;  %v1681_v58 = vor.u32 %v2024_v49, %v1678_v51 }
  0x5d   :  { %981 = vmatpush.bf16.msra.mxu2 %v1497_v3  ;;  %v1838_v3 = vld [vmem:[#allocation2 + $0x3f8] sm:$0xf0] }
  0x5e   :  { %994 = vmatpush.bf16.msra.mxu3 %v1561_v10  ;;  %v1777_v10 = vor.u32 %v2048_v62, %v1774_v63  ;;  %v1841_v14 = vor.u32 %v2064_v2, %v1838_v3  ;;  %v2022_v62 = vld [vmem:[#allocation2 + $0x2a4] sm:$0xf]  ;;  %v1809_v63 = vor.u32 %v2056_v54, %v1806_v55  ;;  %v1734_v2 = vld [vmem:[#allocation2 + $0x328] sm:$0xf0] }
  0x5f   :  { %956 = vmatpush.bf16.msra.mxu0 %v1361_v16  ;;  %v2046_v16 = vld [vmem:[#allocation2 + $0x364] sm:$0xf] }
  0x60   :  { %969 = vmatpush.bf16.msra.mxu1 %v1425_v17  ;;  %v1766_v17 = vld [vmem:[#allocation2 + $0x368] sm:$0xf0]  ;;  %v2054_v3 = vld [vmem:[#allocation2 + $0x3a4] sm:$0xf] }
  0x61   :  { %982 = vmatpush.bf16.msra.mxu2 %v1489_v18  ;;  %v2062_v18 = vld [vmem:[#allocation2 + $0x3e4] sm:$0xf] }
  0x62   :  { %995 = vmatpush.bf16.msra.mxu3 %v1553_v22  ;;  %v1769_v22 = vor.u32 %v2046_v16, %v1766_v17  ;;  %v1833_v26 = vor.u32 %v2062_v18, %v1830_v19  ;;  %v2036_v16 = vld [vmem:[#allocation2 + $0x314] sm:$0xf]  ;;  %v1726_v17 = vld [vmem:[#allocation2 + $0x318] sm:$0xf0] }
  0x63   :  { %957 = vmatpush.bf16.msra.mxu0 %v1353_v28  ;;  %v2044_v28 = vld [vmem:[#allocation2 + $0x354] sm:$0xf]  ;;  %v1790_v19 = vld [vmem:[#allocation2 + $0x398] sm:$0xf0] }
  0x64   :  { %970 = vmatpush.bf16.msra.mxu1 %v1417_v29  ;;  %v1758_v29 = vld [vmem:[#allocation2 + $0x358] sm:$0xf0]  ;;  %v2052_v18 = vld [vmem:[#allocation2 + $0x394] sm:$0xf] }
  0x65   :  { %983 = vmatpush.bf16.msra.mxu2 %v1481_v30  ;;  %v2060_v30 = vld [vmem:[#allocation2 + $0x3d4] sm:$0xf] }
  0x66   :  { %996 = vmatpush.bf16.msra.mxu3 %v1545_v37  ;;  %v1761_v37 = vor.u32 %v2044_v28, %v1758_v29  ;;  %v1825_v41 = vor.u32 %v2060_v30, %v1822_v32  ;;  %v2034_v28 = vld [vmem:[#allocation2 + $0x304] sm:$0xf]  ;;  %v1718_v29 = vld [vmem:[#allocation2 + $0x308] sm:$0xf0] }
  0x67   :  { %958 = vmatpush.bf16.msra.mxu0 %v1345_v44  ;;  %v1750_v44 = vld [vmem:[#allocation2 + $0x348] sm:$0xf0]  ;;  %v2050_v30 = vld [vmem:[#allocation2 + $0x384] sm:$0xf] }
  0x68   :  { %971 = vmatpush.bf16.msra.mxu1 %v1409_v47  ;;  %v2008_v47 = vld [vmem:[#allocation2 + $0x234] sm:$0xf]  ;;  %v1782_v32 = vld [vmem:[#allocation2 + $0x388] sm:$0xf0] }
  0x69   :  { %984 = vmatpush.bf16.msra.mxu2 %v1473_v48  ;;  %v1614_v48 = vld [vmem:[#allocation2 + $0x238] sm:$0xf0] }
  0x6a   :  { %997 = vmatpush.bf16.msra.mxu3 %v1537_v52  ;;  %v2040_v52 = vld [vmem:[#allocation2 + $0x334] sm:$0xf]  ;;  %v1617_v56 = vor.u32 %v2008_v47, %v1614_v48 }
  0x6b   :  { %959 = vmatpush.bf16.msra.mxu0 %v1337_v60  ;;  %v1745_v59 = vor.u32 %v2040_v52, %v1742_v53  ;;  %v2006_v60 = vld [vmem:[#allocation2 + $0x224] sm:$0xf] }
  0x6c   :  { %972 = vmatpush.bf16.msra.mxu1 %v1401_v0  ;;  %v1670_v0 = vld [vmem:[#allocation2 + $0x2a8] sm:$0xf0] }
  0x6d   :  { %985 = vmatpush.bf16.msra.mxu2 %v1465_v1  ;;  %v2038_v1 = vld [vmem:[#allocation2 + $0x324] sm:$0xf] }
  0x6e   :  { %998 = vmatpush.bf16.msra.mxu3 %v1529_v4  ;;  %960 = vmatmul.bf16.vlgmr.msra.gmra.mxu0 %v2221_v5  ;;  %v1814_v5 = vld [vmem:[#allocation2 + $0x3c8] sm:$0xf0] }
  0x6f   :  { %1004 = vmatpush.bf16.msrb.mxu0 %v1649_v8  ;;  %973 = vmatmul.bf16.vlgmr.msra.gmra.mxu1 %v2225_v7  ;;  %v1753_v7 = vor.u32 %v2042_v43, %v1750_v44  ;;  %v1817_v50 = vor.u32 %v2058_v45, %v1814_v5  ;;  %v1798_v4 = vld [vmem:[#allocation2 + $0x3a8] sm:$0xf0]  ;;  %v1609_v8 = vor.u32 %v2006_v60, %v1606_v61  ;;  %v2069_v43 = vld [vmem:[#allocation4 + $0x18] sm:$0xff]  ;;  %v2068_v44 = vld [vmem:[#allocation4 + $0x10] sm:$0xff] }
  0x70   :  { %1017 = vmatpush.bf16.msrb.mxu1 %v1713_v9  ;;  %986 = vmatmul.bf16.vlgmr.msra.gmra.mxu2 %v2209_v57  ;;  %v2026_v57 = vld [vmem:[#allocation2 + $0x2c4] sm:$0xf]  ;;  %v1673_v9 = vor.u32 %v2022_v62, %v1670_v0  ;;  %v2081_v62 = vld [vmem:[#allocation4 + $0x78] sm:$0xff] }
  0x71   :  { %1030 = vmatpush.bf16.msrb.mxu2 %v1777_v10  ;;  %999 = vmatmul.bf16.vlgmr.msra.gmra.mxu3 %v2223_v6  ;;  %v1625_v6 = vor.u32 %v2010_v38, %v1622_v39  ;;  %v1689_v46 = vor.u32 %v2026_v57, %v1686_v42  ;;  %v1737_v10 = vor.u32 %v2038_v1, %v1734_v2  ;;  %v2073_v39 = vld [vmem:[#allocation4 + $0x38] sm:$0xff]  ;;  %v2072_v57 = vld [vmem:[#allocation4 + $0x30] sm:$0xff]  ;;  %v2070_v42 = vld [vmem:[#allocation4 + $0x20] sm:$0xff] }
  0x72   :  { %1043 = vmatpush.bf16.msrb.mxu3 %v1841_v14  ;;  %v1801_v14 = vor.u32 %v2054_v3, %v1798_v4  ;;  %v1785_v38 = vor.u32 %v2050_v30, %v1782_v32  ;;  %v2080_v1 = vld [vmem:[#allocation4 + $0x70] sm:$0xff] }
  0x73   :  { %1005 = vmatpush.bf16.msrb.mxu0 %v1641_v20  ;;  %v1601_v20 = vor.u32 %v2004_v11, %v1598_v12  ;;  %v2078_v11 = vld [vmem:[#allocation4 + $0x60] sm:$0xff]  ;;  %v2077_v12 = vld [vmem:[#allocation4 + $0x58] sm:$0xff] }
  0x74   :  { %1018 = vmatpush.bf16.msrb.mxu1 %v1705_v21  ;;  %v1665_v21 = vor.u32 %v2020_v13, %v1662_v15  ;;  %v2076_v13 = vld [vmem:[#allocation4 + $0x50] sm:$0xff] }
  0x75   :  { %1031 = vmatpush.bf16.msrb.mxu2 %v1769_v22  ;;  %v1729_v22 = vor.u32 %v2036_v16, %v1726_v17  ;;  %v2075_v16 = vld [vmem:[#allocation4 + $0x48] sm:$0xff] }
  0x76   :  { %1044 = vmatpush.bf16.msrb.mxu3 %v1833_v26  ;;  %v1793_v26 = vor.u32 %v2052_v18, %v1790_v19 }
  0x77   :  { %1006 = vmatpush.bf16.msrb.mxu0 %v1633_v33  ;;  %v1593_v33 = vor.u32 %v2002_v23, %v1590_v24 }
  0x78   :  { %1019 = vmatpush.bf16.msrb.mxu1 %v1697_v34  ;;  %v1657_v34 = vor.u32 %v2018_v25, %v1654_v27 }
  0x79   :  { %1032 = vmatpush.bf16.msrb.mxu2 %v1761_v37  ;;  %v1721_v37 = vor.u32 %v2034_v28, %v1718_v29 }
  0x7a   :  { %1045 = vmatpush.bf16.msrb.mxu3 %v1825_v41  ;;  %v2071_v41 = vld [vmem:[#allocation4 + $0x28] sm:$0xff] }
  0x7b   :  { %1007 = vmatpush.bf16.msrb.mxu0 %v1625_v6 }
  0x7c   :  { %1020 = vmatpush.bf16.msrb.mxu1 %v1689_v46 }
  0x7d   :  { %1033 = vmatpush.bf16.msrb.mxu2 %v1753_v7 }
  0x7e   :  { %1046 = vmatpush.bf16.msrb.mxu3 %v1817_v50 }
  0x7f   :  { %1008 = vmatpush.bf16.msrb.mxu0 %v1617_v56 }
  0x80   :  { %1021 = vmatpush.bf16.msrb.mxu1 %v1681_v58 }
  0x81   :  { %1034 = vmatpush.bf16.msrb.mxu2 %v1745_v59 }
  0x82   :  { %1047 = vmatpush.bf16.msrb.mxu3 %v1809_v63 }
  0x83   :  { %1009 = vmatpush.bf16.msrb.mxu0 %v1609_v8  ;;  %v2079_v8 = vld [vmem:[#allocation4 + $0x68] sm:$0xff] }
  0x84   :  { %1022 = vmatpush.bf16.msrb.mxu1 %v1673_v9 }
  0x85   :  { %1035 = vmatpush.bf16.msrb.mxu2 %v1737_v10 }
  0x86   :  { %1048 = vmatpush.bf16.msrb.mxu3 %v1801_v14 }
  0x87   :  { %1010 = vmatpush.bf16.msrb.mxu0 %v1601_v20  ;;  %v2074_v20 = vld [vmem:[#allocation4 + $0x40] sm:$0xff] }
  0x88   :  { %1023 = vmatpush.bf16.msrb.mxu1 %v1665_v21 }
  0x89   :  { %1036 = vmatpush.bf16.msrb.mxu2 %v1729_v22 }
  0x8a   :  { %1049 = vmatpush.bf16.msrb.mxu3 %v1793_v26 }
  0x8b   :  { %1011 = vmatpush.bf16.msrb.mxu0 %v1593_v33 }
  0x8c   :  { %1024 = vmatpush.bf16.msrb.mxu1 %v1657_v34 }
  0x8d   :  { %1037 = vmatpush.bf16.msrb.mxu2 %v1721_v37 }
  0x8e   :  { %1050 = vmatpush.bf16.msrb.mxu3 %v1785_v38  ;;  %1012 = vmatmul.bf16.vlgmr.msrb.gmra.mxu0 %v2244_v35  ;;  %v2067_v35 = vld [vmem:[#allocation4 + $0x8] sm:$0xff] }
  0x8f   :  { %1192 = vmatpush.bf16.msra.mxu0 %v2073_v39  ;;  %1025 = vmatmul.bf16.vlgmr.msrb.gmra.mxu1 %v2248_v40  ;;  %v2066_v40 = vld [vmem:[#allocation4] sm:$0xff] }
  0x90   :  { %1038 = vmatmul.bf16.vlgmr.msrb.gmra.mxu2 %v2242_v31  ;;  %v202_v31 = vld [vmem:[%s2300_s2] sm:$0x3]  ;;  %1205 = vmatpush.bf16.msra.mxu1 %v2081_v62 }
  0x91   :  { %1051 = vmatmul.bf16.vlgmr.msrb.gmra.mxu3 %v2246_v36  ;;  %v204_v46 = vperm.slane %v202_v31, 0  ;;  %v205_v22 = vperm.slane %v202_v31, 1  ;;  %v2086_v31 = vld [vmem:[%s2303_s5 + $0x20] sm:$0xff] }
  0x93   :  { %1193 = vmatpush.bf16.msra.mxu0 %v2072_v57 }
  0x94   :  { %1206 = vmatpush.bf16.msra.mxu1 %v2080_v1 }
  0x97   :  { %1194 = vmatpush.bf16.msra.mxu0 %v2071_v41 }
  0x98   :  { %1207 = vmatpush.bf16.msra.mxu1 %v2079_v8 }
  0x9b   :  { %1195 = vmatpush.bf16.msra.mxu0 %v2070_v42 }
  0x9c   :  { %1208 = vmatpush.bf16.msra.mxu1 %v2078_v11 }
  0x9f   :  { %1196 = vmatpush.bf16.msra.mxu0 %v2069_v43 }
  0xa0   :  { %1209 = vmatpush.bf16.msra.mxu1 %v2077_v12 }
  0xa3   :  { %1197 = vmatpush.bf16.msra.mxu0 %v2068_v44 }
  0xa4   :  { %1210 = vmatpush.bf16.msra.mxu1 %v2076_v13 }
  0xa7   :  { %1198 = vmatpush.bf16.msra.mxu0 %v2067_v35  ;;  %v2087_v35 = vld [vmem:[%s2303_s5 + $0x28] sm:$0xff] }
  0xa8   :  { %1211 = vmatpush.bf16.msra.mxu1 %v2075_v16 }
  0xab   :  { %v857_v45 = vpop.f32.mrf.mxu0  ;;  %1199 = vmatpush.bf16.msra.mxu0 %v2066_v40  ;;  %v2084_v40 = vld [vmem:[%s2303_s5 + $0x10] sm:$0xff] }
  0xac   :  { %v870_v5 = vpop.f32.mrf.mxu1  ;;  %v858_v49 = vadd.f32 %v857_v45, %v204_v46  ;;  %1212 = vmatpush.bf16.msra.mxu1 %v2074_v20 }
  0xae   :  { %v871_v51 = vadd.f32 %v870_v5, %v858_v49  ;;  %v2089_v5 = vld [vmem:[%s2303_s5 + $0x38] sm:$0xff]  ;;  %v2096_v49 = vld [vmem:[%s2302_s4] ss:$0 sm:$0xff] }
  0xaf   :  { %1288 = vmatpush.bf16.msra.mxu2 %v2089_v5 }
  0xb3   :  { %v883_v6 = vpop.f32.mrf.mxu2  ;;  %v859_v7 = vpop.f32.mrf.mxu0 }
  0xb4   :  { %v896_v36 = vpop.f32.mrf.mxu3  ;;  %v872_v47 = vpop.f32.mrf.mxu1  ;;  %v884_v52 = vadd.f32 %v883_v6, %v871_v51  ;;  %v2088_v6 = vld [vmem:[%s2303_s5 + $0x30] sm:$0xff] }
  0xb5   :  { %1289 = vmatpush.bf16.msra.mxu2 %v2088_v6  ;;  %v2083_v47 = vld [vmem:[%s2303_s5 + $0x8] sm:$0xff] }
  0xb6   :  { %v897_v53 = vadd.f32 %v896_v36, %v884_v52  ;;  %v2085_v36 = vld [vmem:[%s2303_s5 + $0x18] sm:$0xff] }
  0xb9   :  { %1290 = vmatpush.bf16.msra.mxu2 %v2087_v35 }
  0xbb   :  { %v885_v48 = vpop.f32.mrf.mxu2 }
  0xbc   :  { %v898_v50 = vpop.f32.mrf.mxu3  ;;  %v2082_v48 = vld [vmem:[%s2303_s5] sm:$0xff] }
  0xbd   :  { %1291 = vmatpush.bf16.msra.mxu2 %v2086_v31 }
  0xc1   :  { %1292 = vmatpush.bf16.msra.mxu2 %v2085_v36 }
  0xc5   :  { %1293 = vmatpush.bf16.msra.mxu2 %v2084_v40 }
  0xc9   :  { %1294 = vmatpush.bf16.msra.mxu2 %v2083_v47 }
  0xcb   :  { %v909_v54 = vpop.f32.mrf.mxu0 }
  0xcc   :  { %v910_v55 = vadd.f32 %v909_v54, %v897_v53  ;;  %v922_v56 = vpop.f32.mrf.mxu1 }
  0xcd   :  { %1295 = vmatpush.bf16.msra.mxu2 %v2082_v48 }
  0xce   :  { %v923_v58 = vadd.f32 %v922_v56, %v910_v55  ;;  %v2097_v56 = vld [vmem:[%s2304_s6] ss:$0 sm:$0xff] }
  0xd3   :  { %v935_v59 = vpop.f32.mrf.mxu2  ;;  %v911_v0 = vpop.f32.mrf.mxu0 }
  0xd4   :  { %v936_v60 = vadd.f32 %v935_v59, %v923_v58  ;;  %v948_v61 = vpop.f32.mrf.mxu3  ;;  %v924_v2 = vpop.f32.mrf.mxu1 }
  0xd6   :  { %v949_v63 = vadd.f32 %v948_v61, %v936_v60 }
  0xd8   :  { %v1056_v3 = vmax.f32 %v949_v63, 0.0 }
  0xda   :  { %v1058_v4 = vpack.c.bf16 %v1056_v3, %v1056_v3 }
  0xdb   :  { %v937_v9 = vpop.f32.mrf.mxu2 }
  0xdc   :  { %1200 = vmatmul.bf16.vlgmr.msra.gmra.mxu0 %v1058_v4  ;;  %v950_v10 = vpop.f32.mrf.mxu3 }
  0xeb   :  { %v961_v14 = vpop.f32.mrf.mxu0 }
  0xec   :  { %v974_v15 = vpop.f32.mrf.mxu1  ;;  %v962_v25 = vadd.f32 %v961_v14, %v205_v22 }
  0xee   :  { %v975_v26 = vadd.f32 %v974_v15, %v962_v25 }
  0xf3   :  { %v987_v17 = vpop.f32.mrf.mxu2  ;;  %v963_v19 = vpop.f32.mrf.mxu0 }
  0xf4   :  { %v1000_v18 = vpop.f32.mrf.mxu3  ;;  %v976_v21 = vpop.f32.mrf.mxu1  ;;  %v988_v27 = vadd.f32 %v987_v17, %v975_v26 }
  0xf6   :  { %v1001_v28 = vadd.f32 %v1000_v18, %v988_v27 }
  0xfb   :  { %v989_v23 = vpop.f32.mrf.mxu2 }
  0xfc   :  { %v1002_v24 = vpop.f32.mrf.mxu3 }
 0x10b   :  { %v1013_v29 = vpop.f32.mrf.mxu0 }
 0x10c   :  { %v1026_v30 = vpop.f32.mrf.mxu1  ;;  %v1014_v32 = vadd.f32 %v1013_v29, %v1001_v28 }
 0x10e   :  { %v1027_v33 = vadd.f32 %v1026_v30, %v1014_v32 }
 0x113   :  { %v1039_v34 = vpop.f32.mrf.mxu2  ;;  %v1015_v39 = vpop.f32.mrf.mxu0 }
 0x114   :  { %v1040_v37 = vadd.f32 %v1039_v34, %v1027_v33  ;;  %v1052_v38 = vpop.f32.mrf.mxu3  ;;  %v1028_v57 = vpop.f32.mrf.mxu1 }
 0x116   :  { %v1053_v41 = vadd.f32 %v1052_v38, %v1040_v37 }
 0x118   :  { %v1057_v42 = vmax.f32 %v1053_v41, 0.0 }
 0x11a   :  { %v1059_v43 = vpack.c.bf16 %v1057_v42, %v1057_v42 }
 0x11b   :  { %v1041_v44 = vpop.f32.mrf.mxu2 }
 0x11c   :  { %v1054_v45 = vpop.f32.mrf.mxu3  ;;  %1213 = vmatmul.bf16.vlgmr.msra.gmra.mxu1 %v1059_v43 }
 0x159   :  { %v1201_v46 = vpop.f32.mrf.mxu0 }
 0x15a   :  { %v1202_v50 = vadd.f32 %v2096_v49, %v1201_v46 }
 0x161   :  { %v1203_v7 = vpop.f32.mrf.mxu0 }
 0x199   :  { %v1214_v51 = vpop.f32.mrf.mxu1 }
 0x19a   :  { %v1215_v52 = vadd.f32 %v1214_v51, %v1202_v50 }
 0x19c   :  { %v1218_v53 = vmax.f32 %v1215_v52, 0.0 }
 0x19e   :  { %v1219_v54 = vpack.c.bf16 %v1218_v53, %v1218_v53 }
 0x1a0   :  { %1296 = vmatmul.bf16.vlgmr.msra.gmra.mxu2 %v1219_v54 }
 0x1a1   :  { %v1216_v55 = vpop.f32.mrf.mxu1 }
 0x223   :  { %v1297_v58 = vpop.f32.mrf.mxu2 }
 0x224   :  { %v1298_v59 = vadd.f32 %v2097_v56, %v1297_v58 }
 0x226   :  { %1301 = vmax.xlane.f32.xlu0 %v1298_v59 }
 0x22b   :  { %v1299_v60 = vpop.f32.mrf.mxu2 }
 0x299   :  { %v1302_v61 = vpop.xlane.xlu0 %1301 }
 0x29a   :  { %v1303_v62 = vsub.f32 %v1298_v59, %v1302_v61 }
 0x29c   :  { %v1304_v63 = vmul.f32 1.442695, %v1303_v62 }
 0x29e   :  { %2098 = vpow2.f32 %v1304_v63 }
 0x2a4   :  { %v2099_v0 = vpop.eup %2098 }
 0x2a5   :  { %1306 = vadd.xlane.f32.xlu0 %v2099_v0 }
 0x318   :  { %v1307_v1 = vpop.xlane.xlu0 %1306 }
 0x319   :  { %2100 = vrcp.f32 %v1307_v1  ;;  %v1319_v8 = vand.u32 2147483648, %v1307_v1  ;;  %v1317_v10 = vand.u32 2147483647, %v1307_v1  ;;  %vm1313_vm1 = vweird.f32 %v1307_v1 }
 0x31b   :  { %v1320_v12 = vor.u32 1.1754944e-38, %v1319_v8  ;;  %vm1318_vm3 = vcmp.eq.f32.partialorder %v1317_v10, 8.507059e+37 }
 0x31f   :  { %v2101_v2 = vpop.eup %2100 }
 0x320   :  { %v1309_v3 = vmul.f32 %v2101_v2, %v1307_v1  ;;  %vm1314_vm0 = vweird.f32 %v2101_v2 }
 0x321   :  { %vm1315_vm2 = vmor %vm1313_vm1, %vm1314_vm0 }
 0x322   :  { %v1310_v4 = vsub.f32 1.0, %v1309_v3 }
 0x324   :  { %v1311_v9 = vmul.f32 %v2101_v2, %v1310_v4 }
 0x326   :  { %v1312_v11 = vadd.f32 %v2101_v2, %v1311_v9 }
 0x328   :  { %v1316_v13 = vsel %vm1315_vm2, %v2101_v2, %v1312_v11 }
 0x329   :  { %v1321_v14 = vsel %vm1318_vm3, %v1320_v12, %v1316_v13 }
 0x32a   :  { %v1322_v15 = vmul.f32 %v2099_v0, %v1321_v14 }
 0x32c   :  { %1323 = vst [vmem:[%s2305_s7] sm:$0xff] %v1322_v15 }
 0x32d   :  { %1328 = vsyncpa [#allocation3], 1 }
 0x32e   :  { %1329 = vsyncpa [#allocation5], 1 }

</bundles_post_ra>
